<compile_context>
chip_gen: v7x
topology: tpu7x:2x2x1
jax: 0.10.0
libtpu: 0.0.40
codegen_flags: <defaults>
</compile_context>

<pallas_src>
import functools

import jax
import jax.numpy as jnp
from jax.experimental import pallas as pl
from jax.experimental.pallas import tpu as pltpu

_VMEM_LIMIT = 32 * 1024 * 1024   # fits v5e/v6e/v7x scoped VMEM; re-derive if tiles grow


def _pick_divisor(total, prefs=(32, 16, 8, 4, 2, 1)):
    for t in prefs:
        if t <= total and total % t == 0:
            return t
    return total


# ---------------------------------------------------------------------------
# Bilinear x2 upsample (align_corners=True), separable, NCHW layout
# ---------------------------------------------------------------------------
def _bilinear_matrix(in_size, out_size):
    """A (out_size, in_size) with out = A @ in, align_corners=True."""
    if in_size == 1:
        return jnp.ones((out_size, 1), jnp.float32)
    src = jnp.arange(out_size, dtype=jnp.float32) * (in_size - 1) / (out_size - 1)
    i0 = jnp.minimum(jnp.floor(src).astype(jnp.int32), in_size - 1)
    i1 = jnp.minimum(i0 + 1, in_size - 1)
    w1 = src - i0.astype(jnp.float32)
    w0 = 1.0 - w1
    rows = jnp.arange(out_size)
    A = jnp.zeros((out_size, in_size), jnp.float32)
    A = A.at[rows, i0].add(w0)
    A = A.at[rows, i1].add(w1)
    return A


def _upsample_kernel(ah_ref, awt_ref, x_ref, o_ref):
    # ah: (Ho, H); awt: (W, Wo); x block: (1, Ct, H, W); o block: (1, Ct, Ho, Wo)
    ct, h, w = x_ref.shape[1], x_ref.shape[2], x_ref.shape[3]
    ho, wo = ah_ref.shape[0], awt_ref.shape[1]
    x = x_ref[0]                                              # (Ct, H, W)
    ahb = jnp.broadcast_to(ah_ref[...], (ct, ho, h))
    awtb = jnp.broadcast_to(awt_ref[...], (ct, w, wo))
    # H pass: (Ct, Ho, H) @ (Ct, H, W) -> (Ct, Ho, W)
    zh = jax.lax.dot_general(ahb, x, (((2,), (1,)), ((0,), (0,))),
                             preferred_element_type=jnp.float32)
    # W pass: (Ct, Ho, W) @ (Ct, W, Wo) -> (Ct, Ho, Wo)   (lane-dense Wo output)
    out = jax.lax.dot_general(zh, awtb, (((2,), (1,)), ((0,), (0,))),
                              preferred_element_type=jnp.float32)
    o_ref[0] = out


def bilinear_upsample_x2_nchw(x_nchw):
    N, C, H, W = x_nchw.shape
    Ho, Wo = 2 * H, 2 * W
    ah = _bilinear_matrix(H, Ho)          # (Ho, H)
    awt = _bilinear_matrix(W, Wo).T       # (W, Wo)
    ct = _pick_divisor(C)
    return pl.pallas_call(
        _upsample_kernel,
        out_shape=jax.ShapeDtypeStruct((N, C, Ho, Wo), jnp.float32),
        grid=(N, C // ct),
        in_specs=[
            pl.BlockSpec((Ho, H), lambda n, c: (0, 0)),
            pl.BlockSpec((W, Wo), lambda n, c: (0, 0)),
            pl.BlockSpec((1, ct, H, W), lambda n, c: (n, c, 0, 0)),
        ],
        out_specs=pl.BlockSpec((1, ct, Ho, Wo), lambda n, c: (n, c, 0, 0)),
        compiler_params=pltpu.CompilerParams(
            dimension_semantics=("parallel", "parallel"),
            vmem_limit_bytes=_VMEM_LIMIT),
    )(ah, awt, x_nchw.astype(jnp.float32))


# ---------------------------------------------------------------------------
# Shared conv helpers (NHWC, 3x3, stride 1, halo handled in VMEM)
# ---------------------------------------------------------------------------
def _zero_halo(pad_ref, H, W):
    """Zero only the 1-pixel border of a (H+2, W+2, C) VMEM scratch."""
    C = pad_ref.shape[-1]
    zrow = jnp.zeros((1, W + 2, C), jnp.float32)
    zcol = jnp.zeros((H + 2, 1, C), jnp.float32)
    pad_ref[0:1, :, :] = zrow
    pad_ref[H + 1:H + 2, :, :] = zrow
    pad_ref[:, 0:1, :] = zcol
    pad_ref[:, W + 1:W + 2, :] = zcol


def _conv3x3_acc(xpad, w_ref, acc, H, W):
    cin = xpad.shape[-1]
    for ky in range(3):
        for kx in range(3):
            patch = xpad[ky:ky + H, kx:kx + W, :].reshape(H * W, cin)
            acc = acc + jnp.dot(patch, w_ref[ky, kx],
                                preferred_element_type=jnp.float32)
    return acc


# ---------------------------------------------------------------------------
# Kernel 1: fused concat + conv1 + bias, plus per-image BN partial sums
# ---------------------------------------------------------------------------
def _concat_conv1_kernel(x2_ref, x1_ref, wa_ref, wb_ref, b_ref,
                         y_ref, s_ref, pada_ref, padb_ref, *, H, W):
    cmid = wa_ref.shape[-1]
    # fused torch.cat + conv halo: each concat half gets its own padded VMEM tile
    _zero_halo(pada_ref, H, W)
    _zero_halo(padb_ref, H, W)
    pada_ref[1:H + 1, 1:W + 1, :] = x2_ref[0]
    padb_ref[1:H + 1, 1:W + 1, :] = x1_ref[0]

    acc = jnp.zeros((H * W, cmid), jnp.float32)
    acc = _conv3x3_acc(pada_ref[...], wa_ref, acc, H, W)   # x2 half of w1
    acc = _conv3x3_acc(padb_ref[...], wb_ref, acc, H, W)   # x1 half of w1
    acc = acc + b_ref[...]

    y_ref[0] = acc.reshape(H, W, cmid)
    # per-image partial sums for global (training-mode) BatchNorm statistics
    s_ref[0:1, 0:1, :] = jnp.sum(acc, axis=0, keepdims=True)[None]
    s_ref[0:1, 1:2, :] = jnp.sum(acc * acc, axis=0, keepdims=True)[None]


def concat_conv3x3(x2, x1u, w1a, w1b, b1):
    # TODO(synk): for large spatial sizes, tile H rows (with halo) instead of whole-image blocks.
    N, H, W, c2 = x2.shape
    c1 = x1u.shape[-1]
    cmid = w1a.shape[-1]
    kernel = functools.partial(_concat_conv1_kernel, H=H, W=W)
    return pl.pallas_call(
        kernel,
        out_shape=(jax.ShapeDtypeStruct((N, H, W, cmid), jnp.float32),
                   jax.ShapeDtypeStruct((N, 2, cmid), jnp.float32)),
        grid=(N,),
        in_specs=[
            pl.BlockSpec((1, H, W, c2), lambda n: (n, 0, 0, 0)),
            pl.BlockSpec((1, H, W, c1), lambda n: (n, 0, 0, 0)),
            pl.BlockSpec((3, 3, c2, cmid), lambda n: (0, 0, 0, 0)),
            pl.BlockSpec((3, 3, c1, cmid), lambda n: (0, 0, 0, 0)),
            pl.BlockSpec((1, cmid), lambda n: (0, 0)),
        ],
        out_specs=[
            pl.BlockSpec((1, H, W, cmid), lambda n: (n, 0, 0, 0)),
            pl.BlockSpec((1, 2, cmid), lambda n: (n, 0, 0)),
        ],
        scratch_shapes=[pltpu.VMEM((H + 2, W + 2, c2), jnp.float32),
                        pltpu.VMEM((H + 2, W + 2, c1), jnp.float32)],
        compiler_params=pltpu.CompilerParams(
            dimension_semantics=("parallel",),
            vmem_limit_bytes=_VMEM_LIMIT),
    )(x2, x1u, w1a, w1b, b1)


# ---------------------------------------------------------------------------
# Kernel 2: BN1(affine)+ReLU + conv2 + bias, plus per-image BN partial sums
# ---------------------------------------------------------------------------
def _bn_relu_conv2_kernel(y_ref, sc_ref, sh_ref, w_ref, b_ref,
                          o_ref, s_ref, pad_ref, *, H, W):
    cout = w_ref.shape[-1]
    h1 = jnp.maximum(y_ref[0] * sc_ref[...] + sh_ref[...], 0.0)   # BN1 + ReLU
    _zero_halo(pad_ref, H, W)
    pad_ref[1:H + 1, 1:W + 1, :] = h1

    acc = jnp.zeros((H * W, cout), jnp.float32)
    acc = _conv3x3_acc(pad_ref[...], w_ref, acc, H, W)
    acc = acc + b_ref[...]

    o_ref[0] = acc.reshape(H, W, cout)
    s_ref[0:1, 0:1, :] = jnp.sum(acc, axis=0, keepdims=True)[None]
    s_ref[0:1, 1:2, :] = jnp.sum(acc * acc, axis=0, keepdims=True)[None]


def bn_relu_conv3x3(y1, scale1, shift1, w2, b2):
    N, H, W, cmid = y1.shape
    cout = w2.shape[-1]
    kernel = functools.partial(_bn_relu_conv2_kernel, H=H, W=W)
    return pl.pallas_call(
        kernel,
        out_shape=(jax.ShapeDtypeStruct((N, H, W, cout), jnp.float32),
                   jax.ShapeDtypeStruct((N, 2, cout), jnp.float32)),
        grid=(N,),
        in_specs=[
            pl.BlockSpec((1, H, W, cmid), lambda n: (n, 0, 0, 0)),
            pl.BlockSpec((1, cmid), lambda n: (0, 0)),
            pl.BlockSpec((1, cmid), lambda n: (0, 0)),
            pl.BlockSpec((3, 3, cmid, cout), lambda n: (0, 0, 0, 0)),
            pl.BlockSpec((1, cout), lambda n: (0, 0)),
        ],
        out_specs=[
            pl.BlockSpec((1, H, W, cout), lambda n: (n, 0, 0, 0)),
            pl.BlockSpec((1, 2, cout), lambda n: (n, 0, 0)),
        ],
        scratch_shapes=[pltpu.VMEM((H + 2, W + 2, cmid), jnp.float32)],
        compiler_params=pltpu.CompilerParams(
            dimension_semantics=("parallel",),
            vmem_limit_bytes=_VMEM_LIMIT),
    )(y1, scale1, shift1, w2, b2)


# ---------------------------------------------------------------------------
# Kernel 3: BN2(affine) + ReLU (elementwise)
# ---------------------------------------------------------------------------
def _bn_relu_kernel(y_ref, sc_ref, sh_ref, o_ref):
    o_ref[0] = jnp.maximum(y_ref[0] * sc_ref[...] + sh_ref[...], 0.0)


def bn_relu(y, scale, shift):
    N, H, W, c = y.shape
    return pl.pallas_call(
        _bn_relu_kernel,
        out_shape=jax.ShapeDtypeStruct((N, H, W, c), jnp.float32),
        grid=(N,),
        in_specs=[
            pl.BlockSpec((1, H, W, c), lambda n: (n, 0, 0, 0)),
            pl.BlockSpec((1, c), lambda n: (0, 0)),
            pl.BlockSpec((1, c), lambda n: (0, 0)),
        ],
        out_specs=pl.BlockSpec((1, H, W, c), lambda n: (n, 0, 0, 0)),
        compiler_params=pltpu.CompilerParams(
            dimension_semantics=("parallel",),
            vmem_limit_bytes=_VMEM_LIMIT),
    )(y, scale, shift)


def _bn_affine(stats, count, gamma, beta, eps):
    """Fold training-mode BN (global batch stats) into per-channel scale/shift."""
    tot = jnp.sum(stats, axis=0)                              # (2, C)
    mean = tot[0] / count
    var = jnp.maximum(tot[1] / count - mean * mean, 0.0)      # biased variance
    scale = gamma * jax.lax.rsqrt(var + eps)                  # (1, C)
    shift = beta - mean * scale                               # (1, C)
    return scale, shift


# ---------------------------------------------------------------------------
# Up.forward
# ---------------------------------------------------------------------------
def up_forward(x1_nchw, x2_nchw, params, eps=1e-5):
    x2 = jnp.transpose(x2_nchw, (0, 2, 3, 1)).astype(jnp.float32)   # skip, NHWC

    # bilinear x2 upsample (separable) in NCHW, then to NHWC for the convs
    x1u = jnp.transpose(bilinear_upsample_x2_nchw(x1_nchw), (0, 2, 3, 1))

    # F.pad(x1, ...) to match the skip's spatial size (no-op when already equal)
    diffY = x2.shape[1] - x1u.shape[1]
    diffX = x2.shape[2] - x1u.shape[2]
    if diffY != 0 or diffX != 0:
        x1u = jnp.pad(x1u, ((0, 0),
                            (diffY // 2, diffY - diffY // 2),
                            (diffX // 2, diffX - diffX // 2),
                            (0, 0)))

    N, H, W, c2 = x2.shape

    # torch.cat([x2, x1], dim=1) is fused into conv1 by splitting w1 along cin
    w1a = params["w1"][:, :, :c2, :]
    w1b = params["w1"][:, :, c2:, :]

    y1, s1 = concat_conv3x3(x2, x1u, w1a, w1b, params["b1"])
    scale1, shift1 = _bn_affine(s1, N * H * W, params["g1"], params["be1"], eps)
    y2, s2 = bn_relu_conv3x3(y1, scale1, shift1, params["w2"], params["b2"])
    scale2, shift2 = _bn_affine(s2, N * H * W, params["g2"], params["be2"], eps)
    out = bn_relu(y2, scale2, shift2)
    return jnp.transpose(out, (0, 3, 1, 2))                  # back to NCHW


def init_params(key, in_channels, out_channels):
    # Up(bilinear=True): DoubleConv(in_channels, out_channels // 2, in_channels // 2)
    cin = in_channels
    cmid = in_channels // 2
    cout = out_channels // 2
    ks = jax.random.split(key, 8)
    return {
        "w1": 0.1 * jax.random.normal(ks[0], (3, 3, cin, cmid), jnp.float32),
        "b1": 0.1 * jax.random.normal(ks[1], (1, cmid), jnp.float32),
        "g1": 1.0 + 0.1 * jax.random.normal(ks[2], (1, cmid), jnp.float32),
        "be1": 0.1 * jax.random.normal(ks[3], (1, cmid), jnp.float32),
        "w2": 0.1 * jax.random.normal(ks[4], (3, 3, cmid, cout), jnp.float32),
        "b2": 0.1 * jax.random.normal(ks[5], (1, cout), jnp.float32),
        "g2": 1.0 + 0.1 * jax.random.normal(ks[6], (1, cout), jnp.float32),
        "be2": 0.1 * jax.random.normal(ks[7], (1, cout), jnp.float32),
    }


if __name__ == "__main__":
    key = jax.random.PRNGKey(0)
    k1, k2, kp = jax.random.split(key, 3)

    in_channels, out_channels = 8, 8
    # UNet Up: x1 comes from below (half channels, half spatial), x2 is the skip.
    x1 = jax.random.normal(k1, (2, in_channels // 2, 8, 8), jnp.float32)     # NCHW
    x2 = jax.random.normal(k2, (2, in_channels // 2, 16, 16), jnp.float32)   # NCHW

    params = init_params(kp, in_channels, out_channels)

    out = up_forward(x1, x2, params)
    out = jax.block_until_ready(out)
    assert out.shape == (2, out_channels // 2, 16, 16), out.shape
    print("KERNEL_OK")
</pallas_src>

<mosaic_0001>
module attributes {stable_mosaic.version = 11 : i64} {
  func.func @_upsample_kernel(%arg0: i32, %arg1: i32, %arg2: memref<16x8xf32, #tpu.memory_space<vmem>>, %arg3: memref<8x16xf32, #tpu.memory_space<vmem>>, %arg4: memref<1x4x8x8xf32, #tpu.memory_space<vmem>>, %arg5: memref<1x4x16x16xf32, #tpu.memory_space<vmem>>) attributes {dimension_semantics = [#tpu.dimension_semantics<parallel>, #tpu.dimension_semantics<parallel>], iteration_bounds = array<i64: 2, 1>, scalar_prefetch = 0 : i64, scratch_operands = 0 : i64, tpu.core_type = #tpu.core_type<tc>, window_params = [{pipeline_mode = #tpu.pipeline_mode<synchronous>, transform_indices = @transform_0, window_bounds = array<i64: 16, 8>}, {pipeline_mode = #tpu.pipeline_mode<synchronous>, transform_indices = @transform_1, window_bounds = array<i64: 8, 16>}, {transform_indices = @transform_2, window_bounds = array<i64: 1, 4, 8, 8>}, {transform_indices = @transform_3, window_bounds = array<i64: 1, 4, 16, 16>}]} {
    %c0 = arith.constant 0 : index
    %c0_0 = arith.constant 0 : index
    %c0_1 = arith.constant 0 : index
    %c0_2 = arith.constant 0 : index
    %0 = vector.load %arg4[%c0, %c0_0, %c0_1, %c0_2] : memref<1x4x8x8xf32, #tpu.memory_space<vmem>>, vector<1x4x8x8xf32>
    %1 = vector.shape_cast %0 : vector<1x4x8x8xf32> to vector<4x8x8xf32>
    %c0_3 = arith.constant 0 : index
    %c0_4 = arith.constant 0 : index
    %2 = vector.load %arg2[%c0_3, %c0_4] : memref<16x8xf32, #tpu.memory_space<vmem>>, vector<16x8xf32>
    %3 = vector.shape_cast %2 : vector<16x8xf32> to vector<1x16x8xf32>
    %4 = vector.broadcast %3 : vector<1x16x8xf32> to vector<4x16x8xf32>
    %c0_5 = arith.constant 0 : index
    %c0_6 = arith.constant 0 : index
    %5 = vector.load %arg3[%c0_5, %c0_6] : memref<8x16xf32, #tpu.memory_space<vmem>>, vector<8x16xf32>
    %6 = vector.shape_cast %5 : vector<8x16xf32> to vector<1x8x16xf32>
    %7 = vector.broadcast %6 : vector<1x8x16xf32> to vector<4x8x16xf32>
    %cst = arith.constant dense<0.000000e+00> : vector<4x16x8xf32>
    %8 = tpu.matmul %4, %1, %cst {dimension_numbers = #tpu.dot_dimension_numbers<[2], [1], [1], [2], [0, 0, 0, 1, 1, 2], [0], [0]>} : vector<4x16x8xf32>, vector<4x8x8xf32>, vector<4x16x8xf32> -> vector<4x16x8xf32>
    %cst_7 = arith.constant dense<0.000000e+00> : vector<4x16x16xf32>
    %9 = tpu.matmul %8, %7, %cst_7 {dimension_numbers = #tpu.dot_dimension_numbers<[2], [1], [1], [2], [0, 0, 0, 1, 1, 2], [0], [0]>} : vector<4x16x8xf32>, vector<4x8x16xf32>, vector<4x16x16xf32> -> vector<4x16x16xf32>
    %c0_8 = arith.constant 0 : index
    %c0_9 = arith.constant 0 : index
    %c0_10 = arith.constant 0 : index
    %c0_11 = arith.constant 0 : index
    %10 = vector.load %arg5[%c0_8, %c0_9, %c0_10, %c0_11] : memref<1x4x16x16xf32, #tpu.memory_space<vmem>>, vector<1x4x16x16xf32>
    %11 = vector.shape_cast %10 : vector<1x4x16x16xf32> to vector<4x16x16xf32>
    %12 = vector.shape_cast %9 : vector<4x16x16xf32> to vector<1x4x16x16xf32>
    tpu.vector_store %arg5[%c0_8, %c0_9, %c0_10, %c0_11], %12 {strides = array<i32>} : memref<1x4x16x16xf32, #tpu.memory_space<vmem>>, vector<1x4x16x16xf32>,
    return
  }
  func.func @transform_0(%arg0: i32, %arg1: i32) -> (i32, i32) {
    %c0_i32 = arith.constant 0 : i32
    %c0_i32_0 = arith.constant 0 : i32
    %c0_i32_1 = arith.constant 0 : i32
    return %c0_i32, %c0_i32_0 : i32, i32
  }
  func.func @transform_1(%arg0: i32, %arg1: i32) -> (i32, i32) {
    %c0_i32 = arith.constant 0 : i32
    %c0_i32_0 = arith.constant 0 : i32
    %c0_i32_1 = arith.constant 0 : i32
    return %c0_i32, %c0_i32_0 : i32, i32
  }
  func.func @transform_2(%arg0: i32, %arg1: i32) -> (i32, i32, i32, i32) {
    %c0_i32 = arith.constant 0 : i32
    %c0_i32_0 = arith.constant 0 : i32
    %c0_i32_1 = arith.constant 0 : i32
    return %arg0, %arg1, %c0_i32, %c0_i32_0 : i32, i32, i32, i32
  }
  func.func @transform_3(%arg0: i32, %arg1: i32) -> (i32, i32, i32, i32) {
    %c0_i32 = arith.constant 0 : i32
    %c0_i32_0 = arith.constant 0 : i32
    %c0_i32_1 = arith.constant 0 : i32
    return %arg0, %arg1, %c0_i32, %c0_i32_0 : i32, i32, i32, i32
  }
}

</mosaic_0001>

<bundles_post_ra>
// kernel: tpu_custom_call.1
= control target key start
LH: loop header
LB: loop body
LE: loop exit
PB: predicated region body
PF: predicated region fallthrough
CT: control target
= control target key end

     0   :  { %8 = vsyncpa [#allocation3], 0  ;;  %s1472_s0 = inlined_call_operand.vmem [shape: f32[16,8], index: 0, kind: input, shape index: {}]   ;;  %s1473_s1 = inlined_call_operand.vmem [shape: f32[8,16], index: 1, kind: input, shape index: {}]   ;;  %s1474_s2 = inlined_call_operand.hbm [shape: f32[2,4,8,8], index: 2, kind: input, shape index: {}]   ;;  %s1475_s3 = inlined_call_operand.hbm [shape: f32[2,4,16,16], index: 3, kind: output, shape index: {}]  }
   0x1   :  { %10 = vsyncpa [#allocation3 + $0x1], 0 }
   0x2   :  { %11 = vsyncpa [#allocation4], 0 }
   0x3   :  { %13 = vsyncpa [#allocation4 + $0x1], 0  ;;  %s1263_s12 = smov 0   ;;  %s1265_s13 = smov 0  }
   0x4   :  { %s1267_s14 = smov 0   ;;  %s1269_s15 = smov 0  }
   0x5   :  { %s1271_s16 = smov 0   ;;  %s1273_s17 = smov 0  }
   0x6 LB: > { %s960_s18 = sadd.s32 4294967295, %s1235_s17   ;;  %s961_s19 = sadd.s32 4294967294, %s1235_s17   ;;  %s1235_s17 = sphi %s1273_s17, %s19_s17   ;;  %s1231_s16 = sphi %s1271_s16, %s1490_s16   ;;  %s1227_s15 = sphi %s1269_s15, %s1489_s15   ;;  %s1223_s14 = sphi %s1267_s14, %s1488_s14   ;;  %s1219_s13 = sphi %s1265_s13, %s1487_s13   ;;  %s1215_s12 = sphi %s1263_s12, %s1486_s12  }
   0x7   : > { %s31_s20 = sadd.s32 1, %s1231_s16  ;;  %s82_s21 = sadd.s32 1, %s1223_s14 }
   0x8   : > { %p33_p0 = scmp.ge.s32.totalorder %s31_s20, 2  ;;  %p89_p1 = scmp.ne.s32.totalorder %s1223_s14, %s1219_s13 }
   0x9   : > { %p90_p2 = scmp.eq.s32.totalorder %s1235_s17, 0  ;;  %p95_p3 = scmp.ne.s32.totalorder %s1219_s13, %s1215_s12 }
   0xa   : > { %s1492_s20 = smov (%p33_p0, %s31_s20), 0  ;;  %p96_p5 = scmp.eq.s32.totalorder %s960_s18, 0 }
   0xb   : > { %p1304_p4 = por %p90_p2, %p89_p1  ;;  %s77_s23 = ssub.s32 %s1231_s16, %s1492_s20 }
   0xc   : > { %p121_p6 = scmp.eq.s32.totalorder %s960_s18, 1  ;;  %p80_p7 = scmp.eq.s32.totalorder %s77_s23, 0 }
   0xd   : > { %p1310_p8 = por %p96_p5, %p95_p3  ;;  %p127_p10 = scmp.eq.s32.totalorder %s961_s19, 1 }
   0xe   : > { %p1314_p9 = por %p121_p6, %p89_p1  ;;  %p1069_p13 = scmp.lt.s32.totalorder %s1235_s17, 2 }
   0xf   : > { %s1319_s26 = scalar_select %p80_p7, %s1223_s14, %s82_s21  }
  0x10   : > { %s1479_s25 = scalar_select %p1314_p9, 1, 0 }
  0x11   : > { %p1321_p11 = por %p127_p10, %p95_p3  ;;  %s153_s28 = sand.u32 1, %s1223_s14  }
  0x12   : > { %s964_s29 = sshll.u32 %s153_s28, 5  ;;  %s991_s30 = sshll.u32 %s1231_s16, 9 }
  0x13   : > { %s1480_s27 = scalar_select %p1321_p11, 1, 0 }
  0x14   : > { %s1332_s6 = scalar_lea.hbm %s1474_s2, %s991_s30  ;;  %s157_s7 = scalar_lea.vmem [#allocation2], %s964_s29 }
  0x15   : > { %s166_s8 = sshll.u32 %s157_s7, 4  ;;  %p1338_p0 = pnand %p1069_p13, %p1304_p4  ;;  %s1334_s8 = int_to_ptr.vmem [resolvable:$true] %s166_s8 }
  0x16   : > { %s1343_s10 = scalar_lea.sflag [#allocation3], %s153_s28  ;;  %s1123_s11 = scalar_lea.hbm %s1332_s6, 512 }
  0x17   : > { %p1124_p2 = scmp.ne.s32.totalorder %s1332_s6, %s1123_s11  ;;  %p1125_p3 = pneg %p1338_p0 }
  0x18   : > { %s1128_s21 = scalar_lea.hbm %s1474_s2, 1024  ;;  %p1129_p4 = scmp.lt.u32.totalorder %s1332_s6, %s1474_s2 }
  0x19   : > { %p1126_p5 = pnand %p1125_p3, %p1124_p2  ;;  %p1130_p7 = scmp.lt.u32.totalorder %s1128_s21, %s1123_s11 }
  0x1a   : > { %p1132_p13 = scmp.lt.u32.totalorder %s1123_s11, %s1332_s6 }
  0x1b   : > { %p1127_p6 = pneg %p1126_p5  ;;  %p1131_p10 = por %p1130_p7, %p1129_p4 }
  0x1d   : > { %p1133_p12 = por %p1132_p13, %p1131_p10 }
  0x1f   : > { %p1134_p1 = pnand %p1133_p12, %p1127_p6 }
  0x21   : > { %1137 = shalt.err (!%p1134_p1)
}
  0x22   : > { %s1138_s28 = scalar_lea.vmem %s1334_s8, 512  ;;  %s1237_s29 = smov [#allocation2]  }
  0x23   : > { %p1139_p2 = scmp.ne.s32.totalorder %s1334_s8, %s1138_s28  ;;  %s1143_s30 = sshll.u32 %s1237_s29, 4  ;;  %s1144_s30 = int_to_ptr.vmem [resolvable:$false] %s1143_s30 }
  0x24   : > { %s1145_s4 = scalar_lea.vmem %s1144_s30, 1024  ;;  %p1146_p9 = scmp.lt.s32.totalorder %s1334_s8, %s1144_s30 }
  0x25   : > { %p1141_p5 = pnand %p1139_p2, %p1125_p3  ;;  %p1147_p4 = scmp.lt.s32.totalorder %s1145_s4, %s1138_s28 }
  0x27   : > { %p1142_p11 = pneg %p1141_p5  ;;  %p1148_p7 = por %p1147_p4, %p1146_p9 }
  0x29   : > { %p1149_p10 = pnand %p1148_p7, %p1142_p11 }
  0x2b   : > { %1152 = shalt.err (!%p1149_p10)
}
  0x2c   : > { %s1238_s5 = smov 128   ;;  %s1239_s7 = smov 8  }
  0x2d   : > { %1064 = dma.hbm_to_vmem [thread:$0]  (!%p1338_p0), %s1332_s6, 512, %s1334_s8, %s1343_s10, %s1238_s5, %s1238_s5, %s1239_s7  }
  0x2e   : > { %p174_p12 = scmp.lt.s32.totalorder %s1235_s17, 3  ;;  %p1482_p1 = scmp.ge.s32.totalorder %s1235_s17, 1 }
  0x30   : > { %p175_p3 = pnand %p1482_p1, %p174_p12 }
  0x31   : > { %s1375_s11 = sand.u32 (!%p175_p3), 1, %s1219_s13  }
  0x32   : > { %178 = sbr.rel (%p175_p3) target bundleno = 508 (0x1fc), region = 32  ;;  %s968_s18 = sshll.u32 (!%p175_p3), %s1375_s11, 5 }
  0x33   : > { %s181_s19 = scalar_lea.sflag (!%p175_p3), [#allocation3], %s1375_s11  ;;  %s184_s21 = scalar_lea.vmem (!%p175_p3), [#allocation2], %s968_s18 }
  0x39   : > { %1206 = dma.done.wait (%p1310_p8), %s181_s19, 512  }
  0x3a   : > { %1208 = vsyncadd (%p1310_p8), %s181_s19, 4294966784  ;;  %vm216_vm0 = vcmask 64512   ;;  %v209_v0 = vld [vmem:[%s184_s21] sm:$0xff]  ;;  %v210_v1 = vld [vmem:[%s184_s21 + $0x8] sm:$0xff]  ;;  %s969_s23 = sshll.u32 %s1375_s11, 6  ;;  %vm847_vm1 = vcmask 130048  }
  0x3b   : > { %v213_v2 = vld [vmem:[%s1472_s0] sm:$0xff]  ;;  %1017 = vmatprep.subr.mxu0 %v209_v0  ;;  %1022 = vmatprep.subr.mxu1 %v210_v1  ;;  %v214_v3 = vld [vmem:[%s1472_s0 + $0x8] sm:$0xff]  ;;  %v212_v5 = vld [vmem:[%s184_s21 + $0x18] sm:$0xff]  ;;  %s206_s28 = scalar_lea.vmem [#allocation5], %s969_s23  ;;  %s992_s30 = sshll.u32 %s1227_s15, 10 }
  0x3c   : > { %1018 = vmatpush3.msra.mxu0 %v209_v0  ;;  %1019 = vmatprep.mubr.msk.f32.mxu0 %vm216_vm0, %v213_v2  ;;  %v211_v4 = vld [vmem:[%s184_s21 + $0x10] sm:$0xff]  ;;  %v215_v6 = vld [vmem:[%s1473_s1] sm:$0xff]  ;;  %s873_s29 = sshll.u32 %s206_s28, 4  ;;  %s1419_s15 = scalar_lea.hbm %s1475_s3, %s992_s30  ;;  %s1412_s29 = int_to_ptr.vmem [resolvable:$true] %s873_s29 }
  0x3d   : > { %1023 = vmatpush3.msra.mxu1 %v210_v1  ;;  %1024 = vmatprep.mubr.msk.f32.mxu1 %vm216_vm0, %v213_v2  ;;  %s857_s7 = scalar_lea.sflag [#allocation4], %s1375_s11  ;;  %s1153_s18 = scalar_lea.vmem %s1412_s29, 1024 }
  0x3e   : > { %1020 = vmatmul.mubr.msk.f32.vlgmr.msra.gmra.mrb[0].mxu0 %vm216_vm0, %v214_v3  ;;  %1025 = vmatmul.mubr.msk.f32.vlgmr.msra.gmra.mrb[0].mxu1 %vm216_vm0, %v214_v3  ;;  %p1154_p8 = scmp.ne.s32.totalorder %s1412_s29, %s1153_s18  ;;  %p1483_p9 = scmp.ne.s32.totalorder %s1479_s25, 0 }
  0x3f   : > { %1027 = vmatprep.subr.mxu0 %v211_v4  ;;  %1032 = vmatprep.subr.mxu1 %v212_v5  ;;  %s1240_s19 = smov [#allocation5]  }
  0x40   : > { %1028 = vmatpush3.msra.mxu0 %v211_v4  ;;  %1033 = vmatpush3.msra.mxu1 %v212_v5  ;;  %p1155_p11 = pnand %p1154_p8, %p1483_p9  ;;  %s1157_s21 = sshll.u32 %s1240_s19, 4  ;;  %s1158_s21 = int_to_ptr.vmem [resolvable:$false] %s1157_s21 }
  0x41   : > { %1029 = vmatprep.mubr.msk.f32.mxu0 %vm216_vm0, %v213_v2  ;;  %1034 = vmatprep.mubr.msk.f32.mxu1 %vm216_vm0, %v213_v2  ;;  %s1159_s6 = scalar_lea.vmem %s1158_s21, 2048  ;;  %p1160_p6 = scmp.lt.s32.totalorder %s1412_s29, %s1158_s21 }
  0x42   : > { %1030 = vmatmul.mubr.msk.f32.vlgmr.msra.gmra.mrb[2].mxu0 %vm216_vm0, %v214_v3  ;;  %1035 = vmatmul.mubr.msk.f32.vlgmr.msra.gmra.mrb[2].mxu1 %vm216_vm0, %v214_v3  ;;  %p1156_p0 = pneg %p1155_p11  ;;  %p1161_p13 = scmp.lt.s32.totalorder %s1159_s6, %s1153_s18 }
  0x43   : > { %1037 = vmatprep.subr.mxu0 %v215_v6  ;;  %1042 = vmatprep.subr.mxu1 %v215_v6 }
  0x44   : > { %1038 = vmatpush3.msra.mxu0 %v215_v6  ;;  %1043 = vmatpush3.msra.mxu1 %v215_v6  ;;  %p1162_p2 = por %p1161_p13, %p1160_p6 }
  0x45   : > { %1047 = vmatprep.subr.mxu0 %v215_v6  ;;  %1052 = vmatprep.subr.mxu1 %v215_v6 }
  0x46   : > { %p1163_p5 = pnand %p1162_p2, %p1156_p0 }
 0x111   : > { %v1021_v7 = vpop.f32.mrb[0].mxu0  ;;  %v1026_v8 = vpop.f32.mrb[0].mxu1 }
 0x112   : > { %v289_v9 = vpop.f32.mrb[1].mxu0  ;;  %v364_v10 = vpop.f32.mrb[1].mxu1 }
 0x113   : > { %1039 = vmatprep.mubr.msk.f32.mxu0 %vm216_vm0, %v289_v9  ;;  %1044 = vmatprep.mubr.msk.f32.mxu1 %vm216_vm0, %v364_v10 }
 0x114   : > { %1040 = vmatmul.mubr.msk.f32.vlgmr.msra.gmra.mrb[4].mxu0 %vm216_vm0, %v1021_v7  ;;  %1045 = vmatmul.mubr.msk.f32.vlgmr.msra.gmra.mrb[4].mxu1 %vm216_vm0, %v1026_v8 }
 0x115   : > { %v1031_v11 = vpop.f32.mrb[2].mxu0  ;;  %v1036_v12 = vpop.f32.mrb[2].mxu1  ;;  %1048 = vmatpush3.msra.mxu0 %v215_v6  ;;  %1053 = vmatpush3.msra.mxu1 %v215_v6 }
 0x116   : > { %v439_v13 = vpop.f32.mrb[3].mxu0  ;;  %v514_v14 = vpop.f32.mrb[3].mxu1 }
 0x117   : > { %1049 = vmatprep.mubr.msk.f32.mxu0 %vm216_vm0, %v439_v13  ;;  %1054 = vmatprep.mubr.msk.f32.mxu1 %vm216_vm0, %v514_v14 }
 0x118   : > { %1050 = vmatmul.mubr.msk.f32.vlgmr.msra.gmra.mrb[6].mxu0 %vm216_vm0, %v1031_v11  ;;  %1055 = vmatmul.mubr.msk.f32.vlgmr.msra.gmra.mrb[6].mxu1 %vm216_vm0, %v1036_v12 }
 0x1e7   : > { %v1041_v15 = vpop.f32.mrb[4].mxu0  ;;  %v1046_v16 = vpop.f32.mrb[4].mxu1 }
 0x1e8   : > { %849 = vst.msk [vmem:[%s206_s28 + $0x8] sm:$0xff] %vm847_vm1, %v1041_v15  ;;  %851 = vst.msk [vmem:[%s206_s28 + $0x18] sm:$0xff] %vm847_vm1, %v1046_v16  ;;  %v595_v17 = vpop.f32.mrb[5].mxu0  ;;  %v676_v18 = vpop.f32.mrb[5].mxu1 }
 0x1e9   : > { %848 = vst.msk [vmem:[%s206_s28] sm:$0xff] %vm847_vm1, %v595_v17  ;;  %850 = vst.msk [vmem:[%s206_s28 + $0x10] sm:$0xff] %vm847_vm1, %v676_v18 }
 0x1eb   : > { %v1051_v19 = vpop.f32.mrb[6].mxu0  ;;  %v1056_v20 = vpop.f32.mrb[6].mxu1 }
 0x1ec   : > { %853 = vst.msk [vmem:[%s206_s28 + $0x28] sm:$0xff] %vm847_vm1, %v1051_v19  ;;  %855 = vst.msk [vmem:[%s206_s28 + $0x38] sm:$0xff] %vm847_vm1, %v1056_v20  ;;  %v757_v21 = vpop.f32.mrb[7].mxu0  ;;  %v838_v22 = vpop.f32.mrb[7].mxu1 }
 0x1ed   : > { %852 = vst.msk [vmem:[%s206_s28 + $0x20] sm:$0xff] %vm847_vm1, %v757_v21  ;;  %854 = vst.msk [vmem:[%s206_s28 + $0x30] sm:$0xff] %vm847_vm1, %v838_v22 }
 0x1ee   : > { %1166 = shalt.err (!%p1163_p5)
}
 0x1ef   : > { %s1167_s8 = scalar_lea.hbm %s1419_s15, 1024  ;;  %s1171_s24 = scalar_lea.hbm %s1475_s3, 2048 }
 0x1f0   : > { %p1168_p4 = scmp.ne.s32.totalorder %s1419_s15, %s1167_s8  ;;  %p1172_p12 = scmp.lt.u32.totalorder %s1419_s15, %s1475_s3 }
 0x1f1   : > { %p1173_p1 = scmp.lt.u32.totalorder %s1171_s24, %s1167_s8  ;;  %p1175_p8 = scmp.lt.u32.totalorder %s1167_s8, %s1419_s15 }
 0x1f2   : > { %p1169_p7 = pnand %p1168_p4, %p1483_p9 }
 0x1f3   : > { %p1174_p3 = por %p1173_p1, %p1172_p12 }
 0x1f4   : > { %p1170_p10 = pneg %p1169_p7 }
 0x1f5   : > { %p1176_p11 = por %p1175_p8, %p1174_p3 }
 0x1f7   : > { %p1177_p0 = pnand %p1176_p11, %p1170_p10 }
 0x1f9   : > { %1180 = shalt.err (!%p1177_p0)
}
 0x1fa   : > { %s1241_s28 = smov 128   ;;  %s1242_s30 = smov 8  }
 0x1fb   : > { %1059 = dma.vmem_to_hbm [thread:$0]  (%p1483_p9), %s1412_s29, 1024, %s1419_s15, %s857_s7, %s1241_s28, %s1241_s28, %s1242_s30  }
 0x1fc PF: > { %s888_s4 = sand.u32 1, %s1215_s12   ;;  %p1484_p6 = scmp.ne.s32.totalorder %s1480_s27, 0 }
 0x1fd   : > { %p1485_p13 = scmp.ge.s32.totalorder %s1235_s17, 2  ;;  %s889_s5 = scalar_lea.sflag [#allocation4], %s888_s4 }
 0x1ff   : > { %p1066_p2 = pnand %p1485_p13, %p1484_p6 }
 0x201   : > { %1210 = dma.done.wait (!%p1066_p2), %s889_s5, 1024  }
 0x202   : > { %1212 = vsyncadd (!%p1066_p2), %s889_s5, 4294966272  ;;  %s19_s17 = sadd.s32 1, %s1235_s17   ;;  %s1486_s12 = smov %s1219_s13 }
 0x203   : > { %p16_p5 = scmp.ge.s32.totalorder %s19_s17, 4   ;;  %s1487_s13 = smov %s1223_s14 }
 0x204   : > { %s1488_s14 = smov %s1319_s26  ;;  %s1489_s15 = smov %s1231_s16 }
 0x205   : > { %s1490_s16 = smov %s1492_s20  ;;  %18 = sbr.rel (!%p16_p5) target bundleno = 6 (0x6), region = 77 }
 0x20c   :  { %894 = vsyncpa [#allocation3], 1 }
 0x20d   :  { %896 = vsyncpa [#allocation3 + $0x1], 1 }
 0x20e   :  { %897 = vsyncpa [#allocation4], 1 }
 0x20f   :  { %899 = vsyncpa [#allocation4 + $0x1], 1 }

</bundles_post_ra>
